<compile_context>
chip_gen: v7x
topology: tpu7x:2x2x1
jax: 0.10.0
libtpu: 0.0.40
codegen_flags: <defaults>
</compile_context>

<pallas_src>
import math
import functools
from typing import NamedTuple

import jax
import jax.numpy as jnp
from jax import lax
from jax.experimental import pallas as pl
from jax.experimental.pallas import tpu as pltpu


def _round_up(x: int, m: int) -> int:
    return ((x + m - 1) // m) * m


def _vmem_capacity_bytes() -> int:
    try:
        return int(pltpu.get_tpu_info().vmem_capacity_bytes)
    except Exception:
        return 64 * 1024 * 1024  # conservative fallback (v7x per-TC physical)


_VMEM_CAP = _vmem_capacity_bytes()
# ~15% headroom for Mosaic internal scratch; never ask for more than ~112 MiB.
_VMEM_BUDGET = int(min(_VMEM_CAP * 0.85, 112 * 1024 * 1024))


def _gelu(h_f32, exact: bool):
    if exact:
        # nn.GELU() default: 0.5 * h * (1 + erf(h / sqrt(2)))
        return 0.5 * h_f32 * (1.0 + lax.erf(h_f32 * (1.0 / math.sqrt(2.0))))
    # Optional tanh approximation (routes to EUP); small deviation vs erf.
    return jax.nn.gelu(h_f32, approximate=True)


# --------------------------------------------------------------------------
# Kernels
# --------------------------------------------------------------------------
def _ffn_resident_kernel(x_ref, w1_ref, b1_ref, w2_ref, b2_ref, o_ref, *,
                         exact_gelu: bool):
    # Weights fully resident in VMEM (constant index maps); no accumulator.
    h = jnp.dot(x_ref[...], w1_ref[...], preferred_element_type=jnp.float32)
    h = _gelu(h + b1_ref[...].astype(jnp.float32), exact_gelu)
    # Dropout(p=0.0) -> identity.
    # TODO(synk): training-mode dropout (p>0) would need pltpu.prng_* masking.
    y = jnp.dot(h.astype(w2_ref.dtype), w2_ref[...],
                preferred_element_type=jnp.float32)
    o_ref[...] = (y + b2_ref[...].astype(jnp.float32)).astype(o_ref.dtype)


def _ffn_ktiled_kernel(x_ref, w1_ref, b1_ref, w2_ref, b2_ref, o_ref, acc_ref,
                       *, exact_gelu: bool):
    # Hidden dim streamed in chunks along grid axis 1 ("arbitrary").
    k = pl.program_id(1)

    @pl.when(k == 0)
    def _():
        acc_ref[...] = jnp.zeros_like(acc_ref)

    h = jnp.dot(x_ref[...], w1_ref[...], preferred_element_type=jnp.float32)
    h = _gelu(h + b1_ref[...].astype(jnp.float32), exact_gelu)
    # Dropout(p=0.0) -> identity.
    acc_ref[...] += jnp.dot(h.astype(w2_ref.dtype), w2_ref[...],
                            preferred_element_type=jnp.float32)

    @pl.when(k == pl.num_programs(1) - 1)
    def _():
        o_ref[...] = (acc_ref[...] + b2_ref[...].astype(jnp.float32)
                      ).astype(o_ref.dtype)


# --------------------------------------------------------------------------
# Tiling plan (static, hashable)
# --------------------------------------------------------------------------
class _Plan(NamedTuple):
    tm: int
    th: int
    resident: bool
    tokens: int
    tokens_p: int
    D_in: int
    D_in_p: int
    H: int
    H_p: int
    D_out: int
    D_out_p: int
    vmem_limit: int


def _make_plan(tokens, D_in, H, D_out, dtype, tm_req=512, th_req=512) -> _Plan:
    dtype_bytes = jnp.dtype(dtype).itemsize
    D_in_p = _round_up(D_in, 128)
    H_p = _round_up(H, 128)
    D_out_p = _round_up(D_out, 128)

    # Row tile: large (>=512 by default) so weight streaming amortizes; shrink
    # for tiny inputs; always a multiple of 8 sublanes.
    tm = max(8, min(_round_up(tm_req, 8), _round_up(tokens, 8)))
    budget = _VMEM_BUDGET

    def resident_bytes(tm_):
        return (2 * dtype_bytes * (D_in_p * H_p + H_p * D_out_p)   # weights (x2 conservative)
                + 2 * dtype_bytes * tm_ * (D_in_p + D_out_p)       # x / out tiles (dbl-buf)
                + 2 * dtype_bytes * (H_p + D_out_p)                # biases
                + (4 + dtype_bytes) * tm_ * H_p)                   # f32 hidden + cast copy

    # Resident-weights fast path: weights DMA'd once, stay in VMEM.
    tm_r = tm
    while tm_r > 8 and resident_bytes(tm_r) > budget:
        tm_r = max(8, tm_r // 2)
    if resident_bytes(tm_r) <= budget and tm_r >= min(tm, 256):
        tokens_p = _round_up(tokens, tm_r)
        return _Plan(tm_r, H_p, True, tokens, tokens_p, D_in, D_in_p, H, H_p,
                     D_out, D_out_p, budget)

    # Fallback: stream hidden dim in th chunks (f32 accumulator path).
    th = min(max(128, _round_up(th_req, 128)), H_p)
    while H_p % th != 0:
        th -= 128

    def ktiled_bytes(tm_, th_):
        return (2 * dtype_bytes * (tm_ * D_in_p + D_in_p * th_ + th_
                                   + th_ * D_out_p + D_out_p + tm_ * D_out_p)
                + 4 * tm_ * D_out_p
                + (4 + dtype_bytes) * tm_ * th_)

    while tm > 256 and ktiled_bytes(tm, th) > budget:
        tm = max(256, tm // 2)
    while th > 128 and ktiled_bytes(tm, th) > budget:
        th_new = th - 128
        while H_p % th_new != 0:
            th_new -= 128
        th = th_new
    tm = max(8, min(tm, _round_up(tokens, 8)))
    tokens_p = _round_up(tokens, tm)
    return _Plan(tm, th, False, tokens, tokens_p, D_in, D_in_p, H, H_p,
                 D_out, D_out_p, budget)


# --------------------------------------------------------------------------
# Wrapper
# --------------------------------------------------------------------------
@functools.partial(jax.jit, static_argnames=("plan", "exact_gelu"))
def _ffn_impl(x2d, w1, b1, w2, b2, *, plan: _Plan, exact_gelu: bool):
    p = plan
    dtype = x2d.dtype
    dtype_bytes = jnp.dtype(dtype).itemsize

    # Zero-pad channel dims to lane multiples (exact: padded weights/bias are
    # zero) and token count to a row-tile multiple.
    x2d = jnp.pad(x2d, ((0, p.tokens_p - p.tokens), (0, p.D_in_p - p.D_in)))
    w1p = jnp.pad(w1, ((0, p.D_in_p - p.D_in), (0, p.H_p - p.H)))
    b1p = jnp.pad(b1, ((0, p.H_p - p.H),)).reshape(1, p.H_p)
    w2p = jnp.pad(w2, ((0, p.H_p - p.H), (0, p.D_out_p - p.D_out)))
    b2p = jnp.pad(b2, ((0, p.D_out_p - p.D_out),)).reshape(1, p.D_out_p)

    grid_i = p.tokens_p // p.tm

    if p.resident:
        grid = (grid_i,)
        kernel = functools.partial(_ffn_resident_kernel, exact_gelu=exact_gelu)
        in_specs = [
            pl.BlockSpec((p.tm, p.D_in_p), lambda i: (i, 0)),      # x row tile
            pl.BlockSpec((p.D_in_p, p.H_p), lambda i: (0, 0)),     # W1 resident
            pl.BlockSpec((1, p.H_p), lambda i: (0, 0)),            # b1 resident
            pl.BlockSpec((p.H_p, p.D_out_p), lambda i: (0, 0)),    # W2 resident
            pl.BlockSpec((1, p.D_out_p), lambda i: (0, 0)),        # b2 resident
        ]
        out_specs = pl.BlockSpec((p.tm, p.D_out_p), lambda i: (i, 0))
        scratch_shapes = []
        dims = ("parallel",)
        weight_fetches = 1
    else:
        grid = (grid_i, p.H_p // p.th)
        kernel = functools.partial(_ffn_ktiled_kernel, exact_gelu=exact_gelu)
        in_specs = [
            pl.BlockSpec((p.tm, p.D_in_p), lambda i, k: (i, 0)),   # x (const over k)
            pl.BlockSpec((p.D_in_p, p.th), lambda i, k: (0, k)),   # W1 chunk
            pl.BlockSpec((1, p.th), lambda i, k: (0, k)),          # b1 chunk
            pl.BlockSpec((p.th, p.D_out_p), lambda i, k: (k, 0)),  # W2 chunk
            pl.BlockSpec((1, p.D_out_p), lambda i, k: (0, 0)),     # b2
        ]
        out_specs = pl.BlockSpec((p.tm, p.D_out_p), lambda i, k: (i, 0))
        scratch_shapes = [pltpu.VMEM((p.tm, p.D_out_p), jnp.float32)]
        dims = ("parallel", "arbitrary")
        weight_fetches = grid_i  # weights re-streamed per row tile

    cost = pl.CostEstimate(
        flops=2 * p.tokens_p * (p.D_in_p * p.H_p + p.H_p * p.D_out_p),
        transcendentals=p.tokens_p * p.H_p,
        bytes_accessed=dtype_bytes * (
            p.tokens_p * p.D_in_p + p.tokens_p * p.D_out_p
            + weight_fetches * (p.D_in_p * p.H_p + p.H_p
                                + p.H_p * p.D_out_p + p.D_out_p)),
    )

    out = pl.pallas_call(
        kernel,
        out_shape=jax.ShapeDtypeStruct((p.tokens_p, p.D_out_p), dtype),
        grid_spec=pltpu.PrefetchScalarGridSpec(
            num_scalar_prefetch=0,
            grid=grid,
            in_specs=in_specs,
            out_specs=out_specs,
            scratch_shapes=scratch_shapes,
        ),
        compiler_params=pltpu.CompilerParams(
            dimension_semantics=dims,
            vmem_limit_bytes=p.vmem_limit,
        ),
        cost_estimate=cost,
    )(x2d, w1p, b1p, w2p, b2p)

    return out[:p.tokens, :p.D_out]


def feed_forward_block(x, w1, b1, w2, b2, *, tm: int = 512, th: int = 512,
                       exact_gelu: bool = True):
    """x: (B, N, D_in); w1: (D_in, H); b1: (H,); w2: (H, D_out); b2: (D_out,)."""
    B, N, D_in = x.shape
    H = w1.shape[1]
    D_out = w2.shape[1]
    tokens = B * N
    plan = _make_plan(tokens, D_in, H, D_out, x.dtype, tm_req=tm, th_req=th)
    y = _ffn_impl(x.reshape(tokens, D_in), w1, b1, w2, b2,
                  plan=plan, exact_gelu=exact_gelu)
    return y.reshape(B, N, D_out)


# --------------------------------------------------------------------------
# Reference + demo
# --------------------------------------------------------------------------
def _reference(x, w1, b1, w2, b2):
    h = jnp.einsum("bnd,dh->bnh", x, w1) + b1
    h = 0.5 * h * (1.0 + lax.erf(h / math.sqrt(2.0)))
    return jnp.einsum("bnh,ho->bno", h, w2) + b2


if __name__ == "__main__":
    # Small, module-consistent shapes.
    B, N = 2, 8
    in_features = 32
    hidden_features = 128          # default would be in_features * 4 = 128
    out_features = in_features     # default: out_features or in_features

    key = jax.random.PRNGKey(0)
    kx, k1, k2, k3, k4 = jax.random.split(key, 5)

    x = jax.random.normal(kx, (B, N, in_features), dtype=jnp.float32)

    # Deterministic parameter init (nn.Linear-like uniform scaling).
    lim1 = 1.0 / math.sqrt(in_features)
    lim2 = 1.0 / math.sqrt(hidden_features)
    w1 = jax.random.uniform(k1, (in_features, hidden_features),
                            minval=-lim1, maxval=lim1, dtype=jnp.float32)
    b1 = jax.random.uniform(k2, (hidden_features,),
                            minval=-lim1, maxval=lim1, dtype=jnp.float32)
    w2 = jax.random.uniform(k3, (hidden_features, out_features),
                            minval=-lim2, maxval=lim2, dtype=jnp.float32)
    b2 = jax.random.uniform(k4, (out_features,),
                            minval=-lim2, maxval=lim2, dtype=jnp.float32)

    y = feed_forward_block(x, w1, b1, w2, b2)
    y = jax.block_until_ready(y)

    y_ref = _reference(x, w1, b1, w2, b2)
    assert y.shape == (B, N, out_features)
    assert jnp.allclose(y, y_ref, atol=1e-4, rtol=1e-4), "mismatch vs reference"

    print("KERNEL_OK")
</pallas_src>

<mosaic_0001>
module attributes {stable_mosaic.version = 11 : i64} {
  func.func @_ffn_resident_kernel(%arg0: i32, %arg1: memref<16x128xf32, #tpu.memory_space<vmem>>, %arg2: memref<128x128xf32, #tpu.memory_space<vmem>>, %arg3: memref<1x128xf32, #tpu.memory_space<vmem>>, %arg4: memref<128x128xf32, #tpu.memory_space<vmem>>, %arg5: memref<1x128xf32, #tpu.memory_space<vmem>>, %arg6: memref<16x128xf32, #tpu.memory_space<vmem>>) attributes {dimension_semantics = [#tpu.dimension_semantics<parallel>], iteration_bounds = array<i64: 1>, scalar_prefetch = 0 : i64, scratch_operands = 0 : i64, tpu.core_type = #tpu.core_type<tc>, window_params = [{transform_indices = @transform_0, window_bounds = array<i64: 16, 128>}, {pipeline_mode = #tpu.pipeline_mode<synchronous>, transform_indices = @transform_1, window_bounds = array<i64: 128, 128>}, {pipeline_mode = #tpu.pipeline_mode<synchronous>, transform_indices = @transform_2, window_bounds = array<i64: 1, 128>}, {pipeline_mode = #tpu.pipeline_mode<synchronous>, transform_indices = @transform_3, window_bounds = array<i64: 128, 128>}, {pipeline_mode = #tpu.pipeline_mode<synchronous>, transform_indices = @transform_4, window_bounds = array<i64: 1, 128>}, {transform_indices = @transform_5, window_bounds = array<i64: 16, 128>}]} {
    %c0 = arith.constant 0 : index
    %c0_0 = arith.constant 0 : index
    %0 = vector.load %arg1[%c0, %c0_0] : memref<16x128xf32, #tpu.memory_space<vmem>>, vector<16x128xf32>
    %c0_1 = arith.constant 0 : index
    %c0_2 = arith.constant 0 : index
    %1 = vector.load %arg2[%c0_1, %c0_2] : memref<128x128xf32, #tpu.memory_space<vmem>>, vector<128x128xf32>
    %cst = arith.constant dense<0.000000e+00> : vector<16x128xf32>
    %2 = tpu.matmul %0, %1, %cst {dimension_numbers = #tpu.dot_dimension_numbers<[1], [0], [0], [1], [0, 0, 1, 1], [], []>} : vector<16x128xf32>, vector<128x128xf32>, vector<16x128xf32> -> vector<16x128xf32>
    %c0_3 = arith.constant 0 : index
    %c0_4 = arith.constant 0 : index
    %3 = vector.load %arg3[%c0_3, %c0_4] : memref<1x128xf32, #tpu.memory_space<vmem>>, vector<1x128xf32>
    %4 = vector.broadcast %3 : vector<1x128xf32> to vector<16x128xf32>
    %5 = arith.addf %2, %4 : vector<16x128xf32>
    %cst_5 = arith.constant 5.000000e-01 : f32
    %6 = vector.broadcast %cst_5 : f32 to vector<16x128xf32>
    %7 = arith.mulf %6, %5 : vector<16x128xf32>
    %cst_6 = arith.constant 0.707106769 : f32
    %8 = vector.broadcast %cst_6 : f32 to vector<16x128xf32>
    %9 = arith.mulf %5, %8 : vector<16x128xf32>
    %10 = math.erf %9 : vector<16x128xf32>
    %cst_7 = arith.constant 1.000000e+00 : f32
    %11 = vector.broadcast %cst_7 : f32 to vector<16x128xf32>
    %12 = arith.addf %11, %10 : vector<16x128xf32>
    %13 = arith.mulf %7, %12 : vector<16x128xf32>
    %c0_8 = arith.constant 0 : index
    %c0_9 = arith.constant 0 : index
    %14 = vector.load %arg4[%c0_8, %c0_9] : memref<128x128xf32, #tpu.memory_space<vmem>>, vector<128x128xf32>
    %cst_10 = arith.constant dense<0.000000e+00> : vector<16x128xf32>
    %15 = tpu.matmul %13, %14, %cst_10 {dimension_numbers = #tpu.dot_dimension_numbers<[1], [0], [0], [1], [0, 0, 1, 1], [], []>} : vector<16x128xf32>, vector<128x128xf32>, vector<16x128xf32> -> vector<16x128xf32>
    %c0_11 = arith.constant 0 : index
    %c0_12 = arith.constant 0 : index
    %16 = vector.load %arg5[%c0_11, %c0_12] : memref<1x128xf32, #tpu.memory_space<vmem>>, vector<1x128xf32>
    %17 = vector.broadcast %16 : vector<1x128xf32> to vector<16x128xf32>
    %18 = arith.addf %15, %17 : vector<16x128xf32>
    %c0_13 = arith.constant 0 : index
    %c0_14 = arith.constant 0 : index
    %19 = vector.load %arg6[%c0_13, %c0_14] : memref<16x128xf32, #tpu.memory_space<vmem>>, vector<16x128xf32>
    tpu.vector_store %arg6[%c0_13, %c0_14], %18 {strides = array<i32>} : memref<16x128xf32, #tpu.memory_space<vmem>>, vector<16x128xf32>,
    return
  }
  func.func @transform_0(%arg0: i32) -> (i32, i32) {
    %c0_i32 = arith.constant 0 : i32
    %c0_i32_0 = arith.constant 0 : i32
    return %arg0, %c0_i32 : i32, i32
  }
  func.func @transform_1(%arg0: i32) -> (i32, i32) {
    %c0_i32 = arith.constant 0 : i32
    %c0_i32_0 = arith.constant 0 : i32
    %c0_i32_1 = arith.constant 0 : i32
    return %c0_i32, %c0_i32_0 : i32, i32
  }
  func.func @transform_2(%arg0: i32) -> (i32, i32) {
    %c0_i32 = arith.constant 0 : i32
    %c0_i32_0 = arith.constant 0 : i32
    %c0_i32_1 = arith.constant 0 : i32
    return %c0_i32, %c0_i32_0 : i32, i32
  }
  func.func @transform_3(%arg0: i32) -> (i32, i32) {
    %c0_i32 = arith.constant 0 : i32
    %c0_i32_0 = arith.constant 0 : i32
    %c0_i32_1 = arith.constant 0 : i32
    return %c0_i32, %c0_i32_0 : i32, i32
  }
  func.func @transform_4(%arg0: i32) -> (i32, i32) {
    %c0_i32 = arith.constant 0 : i32
    %c0_i32_0 = arith.constant 0 : i32
    %c0_i32_1 = arith.constant 0 : i32
    return %c0_i32, %c0_i32_0 : i32, i32
  }
  func.func @transform_5(%arg0: i32) -> (i32, i32) {
    %c0_i32 = arith.constant 0 : i32
    %c0_i32_0 = arith.constant 0 : i32
    return %arg0, %c0_i32 : i32, i32
  }
}

</mosaic_0001>

<bundles_post_ra>
// kernel: _ffn_impl.1
= control target key start
LH: loop header
LB: loop body
LE: loop exit
PB: predicated region body
PF: predicated region fallthrough
CT: control target
= control target key end

     0   :  { %s603_s0 = inlined_call_operand.vmem [shape: f32[16,128], index: 0, kind: input, shape index: {}]   ;;  %s604_s1 = inlined_call_operand.vmem [shape: f32[128,128], index: 1, kind: input, shape index: {}]   ;;  %s605_s2 = inlined_call_operand.vmem [shape: f32[1,128], index: 2, kind: input, shape index: {}]   ;;  %s606_s3 = inlined_call_operand.vmem [shape: f32[128,128], index: 3, kind: input, shape index: {}]   ;;  %s607_s4 = inlined_call_operand.vmem [shape: f32[1,128], index: 4, kind: input, shape index: {}]   ;;  %s608_s5 = inlined_call_operand.hbm [shape: f32[16,128], index: 5, kind: output, shape index: {}]  }
   0x1   :  { %v23_v0 = vld [vmem:[%s604_s1] sm:$0xff]  ;;  %v24_v1 = vld [vmem:[%s604_s1 + $0x8] sm:$0xff]  ;;  %v25_v2 = vld [vmem:[%s604_s1 + $0x10] sm:$0xff] }
   0x2   :  { %v355_v3 = vpack.c.bf16 %v24_v1, %v23_v0  ;;  %v26_v4 = vld [vmem:[%s604_s1 + $0x18] sm:$0xff]  ;;  %v27_v6 = vld [vmem:[%s604_s1 + $0x20] sm:$0xff]  ;;  %v28_v7 = vld [vmem:[%s604_s1 + $0x28] sm:$0xff] }
   0x3   :  { %v359_v5 = vpack.c.bf16 %v26_v4, %v25_v2  ;;  %v363_v8 = vpack.c.bf16 %v28_v7, %v27_v6  ;;  %v29_v9 = vld [vmem:[%s604_s1 + $0x30] sm:$0xff]  ;;  %v30_v10 = vld [vmem:[%s604_s1 + $0x38] sm:$0xff]  ;;  %v21_v11 = vld [vmem:[%s603_s0] sm:$0xff] }
   0x4   :  { %356 = vmatprep.subr.bf16.mxu0 %v355_v3  ;;  %317 = vmatprep.mubr.f32.mxu0 %v21_v11  ;;  %v131_v12 = vld [vmem:[%s606_s3] sm:$0xff]  ;;  %v132_v13 = vld [vmem:[%s606_s3 + $0x8] sm:$0xff]  ;;  %v133_v14 = vld [vmem:[%s606_s3 + $0x10] sm:$0xff] }
   0x5   :  { %358 = vmatpush3.bf16.msra.mxu0 %v355_v3  ;;  %v387_v15 = vpack.c.bf16 %v132_v13, %v131_v12  ;;  %v134_v16 = vld [vmem:[%s606_s3 + $0x18] sm:$0xff]  ;;  %v135_v18 = vld [vmem:[%s606_s3 + $0x20] sm:$0xff]  ;;  %v136_v19 = vld [vmem:[%s606_s3 + $0x28] sm:$0xff] }
   0x6   :  { %360 = vmatprep.subr.bf16.mxu0 %v359_v5  ;;  %v391_v17 = vpack.c.bf16 %v134_v16, %v133_v14 }
   0x9   :  { %362 = vmatpush3.bf16.msra.mxu0 %v359_v5 }
   0xa   :  { %10 = vsyncpa [#allocation3], 0  ;;  %364 = vmatprep.subr.bf16.mxu0 %v363_v8  ;;  %v367_v20 = vpack.c.bf16 %v30_v10, %v29_v9  ;;  %388 = vmatprep.subr.bf16.mxu1 %v387_v15  ;;  %v31_v21 = vld [vmem:[%s604_s1 + $0x40] sm:$0xff]  ;;  %v32_v22 = vld [vmem:[%s604_s1 + $0x48] sm:$0xff]  ;;  %v395_v23 = vpack.c.bf16 %v136_v19, %v135_v18  ;;  %s450_s11 = smov [#allocation2]  }
   0xb   :  { %390 = vmatpush3.bf16.msra.mxu1 %v387_v15  ;;  %v371_v24 = vpack.c.bf16 %v32_v22, %v31_v21  ;;  %v33_v25 = vld [vmem:[%s604_s1 + $0x50] sm:$0xff]  ;;  %v34_v26 = vld [vmem:[%s604_s1 + $0x58] sm:$0xff]  ;;  %v35_v28 = vld [vmem:[%s604_s1 + $0x60] sm:$0xff]  ;;  %s236_s12 = sshll.u32 %s450_s11, 4  ;;  %s237_s12 = int_to_ptr.vmem [resolvable:$true] %s236_s12 }
   0xc   :  { %392 = vmatprep.subr.bf16.mxu1 %v391_v17  ;;  %v375_v27 = vpack.c.bf16 %v34_v26, %v33_v25  ;;  %v36_v29 = vld [vmem:[%s604_s1 + $0x68] sm:$0xff]  ;;  %v37_v31 = vld [vmem:[%s604_s1 + $0x70] sm:$0xff]  ;;  %v38_v32 = vld [vmem:[%s604_s1 + $0x78] sm:$0xff]  ;;  %s426_s13 = scalar_lea.vmem %s237_s12, 256  ;;  %p431_p1 = scmp.lt.s32.totalorder %s237_s12, %s237_s12 }
   0xd   :  { %366 = vmatpush3.bf16.msra.mxu0 %v363_v8  ;;  %v379_v30 = vpack.c.bf16 %v36_v29, %v35_v28  ;;  %v383_v33 = vpack.c.bf16 %v38_v32, %v37_v31  ;;  %v22_v34 = vld [vmem:[%s603_s0 + $0x8] sm:$0xff]  ;;  %v137_v35 = vld [vmem:[%s606_s3 + $0x30] sm:$0xff]  ;;  %v138_v36 = vld [vmem:[%s606_s3 + $0x38] sm:$0xff]  ;;  %p427_p0 = scmp.ne.s32.totalorder %s237_s12, %s426_s13  ;;  %p432_p2 = scmp.lt.s32.totalorder %s426_s13, %s426_s13 }
   0xe   :  { %368 = vmatprep.subr.bf16.mxu0 %v367_v20  ;;  %v399_v37 = vpack.c.bf16 %v138_v36, %v137_v35  ;;  %v139_v38 = vld [vmem:[%s606_s3 + $0x40] sm:$0xff]  ;;  %v140_v39 = vld [vmem:[%s606_s3 + $0x48] sm:$0xff]  ;;  %v141_v41 = vld [vmem:[%s606_s3 + $0x50] sm:$0xff] }
   0xf   :  { %394 = vmatpush3.bf16.msra.mxu1 %v391_v17  ;;  %v403_v40 = vpack.c.bf16 %v140_v39, %v139_v38  ;;  %v142_v42 = vld [vmem:[%s606_s3 + $0x58] sm:$0xff]  ;;  %v143_v44 = vld [vmem:[%s606_s3 + $0x60] sm:$0xff]  ;;  %v144_v45 = vld [vmem:[%s606_s3 + $0x68] sm:$0xff]  ;;  %p433_p3 = por %p432_p2, %p431_p1 }
  0x10   :  { %396 = vmatprep.subr.bf16.mxu1 %v395_v23  ;;  %v407_v43 = vpack.c.bf16 %v142_v42, %v141_v41  ;;  %v411_v46 = vpack.c.bf16 %v144_v45, %v143_v44  ;;  %v145_v47 = vld [vmem:[%s606_s3 + $0x70] sm:$0xff]  ;;  %v146_v48 = vld [vmem:[%s606_s3 + $0x78] sm:$0xff]  ;;  %v247_v50 = vld [vmem:[%s605_s2] ss:$0 sm:$0xff] }
  0x11   :  { %370 = vmatpush3.bf16.msra.mxu0 %v367_v20  ;;  %v415_v49 = vpack.c.bf16 %v146_v48, %v145_v47  ;;  %v248_v1 = vld [vmem:[%s607_s4] ss:$0 sm:$0xff]  ;;  %p434_p4 = pnand %p433_p3, %p427_p0 }
  0x12   :  { %372 = vmatprep.subr.bf16.mxu0 %v371_v24 }
  0x13   :  { %398 = vmatpush3.bf16.msra.mxu1 %v395_v23 }
  0x14   :  { %400 = vmatprep.subr.bf16.mxu1 %v399_v37 }
  0x15   :  { %374 = vmatpush3.bf16.msra.mxu0 %v371_v24 }
  0x16   :  { %376 = vmatprep.subr.bf16.mxu0 %v375_v27 }
  0x17   :  { %402 = vmatpush3.bf16.msra.mxu1 %v399_v37 }
  0x18   :  { %404 = vmatprep.subr.bf16.mxu1 %v403_v40 }
  0x19   :  { %378 = vmatpush3.bf16.msra.mxu0 %v375_v27 }
  0x1a   :  { %380 = vmatprep.subr.bf16.mxu0 %v379_v30 }
  0x1b   :  { %406 = vmatpush3.bf16.msra.mxu1 %v403_v40 }
  0x1c   :  { %408 = vmatprep.subr.bf16.mxu1 %v407_v43 }
  0x1d   :  { %382 = vmatpush3.bf16.msra.mxu0 %v379_v30 }
  0x1e   :  { %384 = vmatprep.subr.bf16.mxu0 %v383_v33 }
  0x1f   :  { %410 = vmatpush3.bf16.msra.mxu1 %v407_v43 }
  0x20   :  { %412 = vmatprep.subr.bf16.mxu1 %v411_v46 }
  0x21   :  { %386 = vmatpush3.bf16.msra.mxu0 %v383_v33 }
  0x23   :  { %414 = vmatpush3.bf16.msra.mxu1 %v411_v46 }
  0x24   :  { %318 = vmatmul.mubr.f32.vlgmr.msra.gmra.mrb[0].mxu0 %v22_v34  ;;  %416 = vmatprep.subr.bf16.mxu1 %v415_v49 }
  0x27   :  { %418 = vmatpush3.bf16.msra.mxu1 %v415_v49 }
  0xf7   :  { %v319_v51 = vpop.f32.mrb[0].mxu0 }
  0xf8   :  { %v118_v52 = vadd.f32 %v319_v51, %v247_v50  ;;  %v112_v53 = vpop.f32.mrb[1].mxu0 }
  0xf9   :  { %v113_v54 = vadd.f32 %v247_v50, %v112_v53 }
  0xfa   :  { %v124_v55 = vmul.f32 0.70710677, %v118_v52  ;;  %v122_v62 = vmul.f32 0.5, %v118_v52 }
  0xfb   :  { %v123_v56 = vmul.f32 0.70710677, %v113_v54  ;;  %v121_v60 = vmul.f32 0.5, %v113_v54 }
  0xfc   :  { %422 = verf.f32 %v124_v55 }
  0xfd   :  { %424 = verf.f32 %v123_v56 }
 0x106   :  { %v423_v57 = vpop.eup %422 }
 0x107   :  { %v425_v58 = vpop.eup %424  ;;  %v128_v59 = vadd.f32 1.0, %v423_v57 }
 0x108   :  { %v127_v61 = vadd.f32 1.0, %v425_v58 }
 0x109   :  { %v130_v0 = vmul.f32 %v128_v59, %v122_v62 }
 0x10a   :  { %v129_v63 = vmul.f32 %v127_v61, %v121_v60 }
 0x10c   :  { %352 = vmatprep.mubr.f32.mxu1 %v129_v63 }
 0x10d   :  { %353 = vmatmul.mubr.f32.vlgmr.msra.gmra.mrb[0].mxu1 %v130_v0 }
 0x1e0   :  { %v354_v2 = vpop.f32.mrb[0].mxu1 }
 0x1e1   :  { %v226_v3 = vadd.f32 %v354_v2, %v248_v1  ;;  %v220_v4 = vpop.f32.mrb[1].mxu1 }
 0x1e2   :  { %v221_v5 = vadd.f32 %v248_v1, %v220_v4 }
 0x1e3   :  { %230 = vst [vmem:[#allocation2 + $0x8] sm:$0xff] %v226_v3 }
 0x1e4   :  { %229 = vst [vmem:[#allocation2] sm:$0xff] %v221_v5 }
 0x1e5   :  { %437 = shalt.err (!%p434_p4)
}
 0x1e6   :  { %s438_s4 = scalar_lea.hbm %s608_s5, 256 }
 0x1e7   :  { %p439_p5 = scmp.ne.s32.totalorder %s608_s5, %s438_s4  ;;  %p442_p6 = scmp.lt.u32.totalorder %s438_s4, %s608_s5 }
 0x1e9   :  { %p444_p7 = pnand %p442_p6, %p439_p5 }
 0x1eb   :  { %447 = shalt.err (!%p444_p7)
}
 0x1ec   :  { %s451_s1 = smov 128   ;;  %s452_s20 = smov 8  }
 0x1ed   :  { %242 = dma.vmem_to_hbm [thread:$0]  %s237_s12, 256, %s608_s5, [#allocation3], %s451_s1, %s451_s1, %s452_s20  }
 0x1ee   :  { %448 = dma.done.wait [#allocation3], 256  }
 0x1ef   :  { %449 = vsyncadd [#allocation3], 4294967040 }
 0x1f0   :  { %246 = vsyncpa [#allocation3], 1 }

</bundles_post_ra>
